<compile_context>
chip_gen: v7x
topology: tpu7x:2x2x1
jax: 0.10.0
libtpu: 0.0.40
codegen_flags: <defaults>
</compile_context>

<pallas_src>
import jax
import jax.numpy as jnp
from jax.experimental import pallas as pl
from jax.experimental.pallas import tpu as pltpu

_LANE = 128


def _make_single_block_kernel(hw_true, bB):
    """Fused path: one (bB, C, HW) slab per grid step; pool + MLP + sigmoid."""
    inv_hw = 1.0 / float(hw_true)

    def kernel(x_ref, w1_ref, b1_ref, w2_ref, b2_ref, o_ref):
        x = x_ref[...].astype(jnp.float32)                        # (bB, C, HW)
        avg = jnp.sum(x, axis=-1) * jnp.float32(inv_hw)           # (bB, C)
        mx = jnp.max(x, axis=-1)                                  # (bB, C)
        stacked = jnp.concatenate([avg, mx], axis=0)              # (2*bB, C)
        h = jnp.dot(stacked, w1_ref[...],
                    preferred_element_type=jnp.float32) + b1_ref[...]
        h = jnp.maximum(h, 0.0)                                   # ReLU
        # NOTE: b2 is added to BOTH branches before the sum on purpose — it
        # matches the PyTorch per-branch shared-MLP forward (do not "fix").
        y = jnp.dot(h, w2_ref[...],
                    preferred_element_type=jnp.float32) + b2_ref[...]
        att = jax.nn.sigmoid(y[:bB, :] + y[bB:, :])               # (bB, C)
        o_ref[...] = att.reshape(o_ref.shape).astype(o_ref.dtype)

    return kernel


def _make_streaming_kernel(hw_true, hw_tile):
    """Streaming path: grid=(B, num_hw), HW (reduction) axis last.

    Lane-wide (1, C, 128) f32 partial sum/max accumulators live in VMEM
    scratch; the steady state is pure VPU elementwise add/max per 128-lane
    chunk.  Masking (both sum and max paths) happens only on the last ragged
    tile; the single cross-lane reduce + MLP epilogue runs only on the last
    tile.
    """
    n_chunks = hw_tile // _LANE
    ragged = (hw_true % hw_tile) != 0
    inv_hw = 1.0 / float(hw_true)

    def kernel(x_ref, w1_ref, b1_ref, w2_ref, b2_ref, o_ref, sum_ref, max_ref):
        hw_idx = pl.program_id(1)
        last = pl.num_programs(1) - 1

        @pl.when(hw_idx == 0)
        def _init():
            sum_ref[...] = jnp.zeros(sum_ref.shape, sum_ref.dtype)
            max_ref[...] = jnp.full(max_ref.shape, -jnp.inf, max_ref.dtype)

        def accumulate(masked):
            ps = sum_ref[...]                                     # (1, C, 128)
            pm = max_ref[...]                                     # (1, C, 128)
            if masked:
                lane = jax.lax.broadcasted_iota(jnp.int32, (1, 1, _LANE), 2)
            for j in range(n_chunks):
                chunk = x_ref[:, :, j * _LANE:(j + 1) * _LANE].astype(jnp.float32)
                if masked:
                    pos = hw_idx * hw_tile + j * _LANE + lane     # (1, 1, 128)
                    valid = pos < hw_true
                    ps = ps + jnp.where(valid, chunk, 0.0)
                    pm = jnp.maximum(pm, jnp.where(valid, chunk, -jnp.inf))
                else:
                    ps = ps + chunk
                    pm = jnp.maximum(pm, chunk)
            sum_ref[...] = ps
            max_ref[...] = pm

        if ragged:
            @pl.when(hw_idx != last)
            def _steady():
                accumulate(False)

            @pl.when(hw_idx == last)
            def _edge():
                accumulate(True)
        else:
            accumulate(False)

        @pl.when(hw_idx == last)
        def _finalize():
            # Single cross-lane (XLU) reduce of the lane-wide accumulators.
            avg = jnp.sum(sum_ref[...], axis=-1) * jnp.float32(inv_hw)  # (1, C)
            mx = jnp.max(max_ref[...], axis=-1)                         # (1, C)
            stacked = jnp.concatenate([avg, mx], axis=0)                # (2, C)
            h = jnp.dot(stacked, w1_ref[...],
                        preferred_element_type=jnp.float32) + b1_ref[...]
            h = jnp.maximum(h, 0.0)
            # b2 added to both branches on purpose (matches PyTorch module).
            y = jnp.dot(h, w2_ref[...],
                        preferred_element_type=jnp.float32) + b2_ref[...]
            att = jax.nn.sigmoid(y[0:1, :] + y[1:2, :])                 # (1, C)
            o_ref[...] = att.reshape(o_ref.shape).astype(o_ref.dtype)

    return kernel


def channel_attention(x, w1, b1, w2, b2, *,
                      block_budget_bytes=8 * 1024 * 1024,
                      stream_target_bytes=2 * 1024 * 1024):
    """x: (B, C, H, W).  Weights in PyTorch Linear convention:
       w1: (mid, C), b1: (mid,), w2: (C, mid), b2: (C,).
       Returns sigmoid channel attention of shape (B, C, 1, 1), float32."""
    B, C, H, W = x.shape
    HW = H * W
    mid = w1.shape[0]

    x_flat = x.reshape(B, C, HW)                  # native dtype on the HBM wire
    dtype_bytes = x_flat.dtype.itemsize
    per_image_bytes = C * HW * dtype_bytes

    # Pre-transpose weights to (in, out) so the kernel does row-major matmuls.
    w1_t = w1.T.astype(jnp.float32)                 # (C, mid)
    b1_r = b1.reshape(1, mid).astype(jnp.float32)   # (1, mid)
    w2_t = w2.T.astype(jnp.float32)                 # (mid, C)
    b2_r = b2.reshape(1, C).astype(jnp.float32)     # (1, C)
    weight_bytes = (C * mid + mid + mid * C + C) * 4

    try:
        vmem_cap = int(pltpu.get_tpu_info().vmem_capacity_bytes)
    except Exception:
        vmem_cap = 64 * 1024 * 1024                 # conservative (v7x per-TC)

    cost = pl.CostEstimate(
        flops=int(2 * B * C * HW + 8 * B * C * mid),
        transcendentals=int(B * C),
        bytes_accessed=int(B * per_image_bytes + B * C * 4 + weight_bytes),
    )

    if per_image_bytes <= block_budget_bytes:
        # ----- Fused path: full H*W per block, batch-blocked. -----
        bB = 1
        for d in range(1, B + 1):
            if B % d != 0 or d * per_image_bytes > block_budget_bytes:
                continue
            bB = d
            if d * per_image_bytes >= stream_target_bytes:
                break

        kernel = _make_single_block_kernel(HW, bB)
        usage = 2 * bB * per_image_bytes + 2 * weight_bytes + 2 * bB * C * 4
        vmem_limit = int(min(max(usage + 4 * 1024 * 1024, 16 * 1024 * 1024),
                             int(vmem_cap * 0.75)))

        out = pl.pallas_call(
            kernel,
            out_shape=jax.ShapeDtypeStruct((B, 1, C), jnp.float32),
            grid_spec=pltpu.PrefetchScalarGridSpec(
                num_scalar_prefetch=0,
                grid=(B // bB,),
                in_specs=[
                    pl.BlockSpec((bB, C, HW), lambda b: (b, 0, 0)),
                    pl.BlockSpec((C, mid), lambda b: (0, 0)),
                    pl.BlockSpec((1, mid), lambda b: (0, 0)),
                    pl.BlockSpec((mid, C), lambda b: (0, 0)),
                    pl.BlockSpec((1, C), lambda b: (0, 0)),
                ],
                out_specs=pl.BlockSpec((bB, 1, C), lambda b: (b, 0, 0)),
            ),
            compiler_params=pltpu.CompilerParams(
                dimension_semantics=("parallel",),
                vmem_limit_bytes=vmem_limit,
            ),
            cost_estimate=cost,
        )(x_flat, w1_t, b1_r, w2_t, b2_r)
    else:
        # ----- Streaming path: lane-aligned H*W tiles, reduction axis last. -----
        max_lanes = max(_LANE,
                        (block_budget_bytes // (C * dtype_bytes)) // _LANE * _LANE)
        hw_tile = min(max_lanes, pl.cdiv(HW, _LANE) * _LANE)
        num_hw = pl.cdiv(HW, hw_tile)

        kernel = _make_streaming_kernel(HW, hw_tile)
        usage = (2 * C * hw_tile * dtype_bytes + 2 * weight_bytes
                 + 2 * C * 4 + 2 * C * _LANE * 4)
        vmem_limit = int(min(max(usage + 4 * 1024 * 1024, 16 * 1024 * 1024),
                             int(vmem_cap * 0.75)))

        # TODO(synk): on v7x with B == 1, split the HW reduction across the two
        # TensorCores (core-parallel leading axis + CMEM combine) so one core
        # isn't idle for the whole bandwidth-bound stream.
        out = pl.pallas_call(
            kernel,
            out_shape=jax.ShapeDtypeStruct((B, 1, C), jnp.float32),
            grid_spec=pltpu.PrefetchScalarGridSpec(
                num_scalar_prefetch=0,
                grid=(B, num_hw),                    # reduction (HW) axis last
                in_specs=[
                    pl.BlockSpec((1, C, hw_tile), lambda b, k: (b, 0, k)),
                    pl.BlockSpec((C, mid), lambda b, k: (0, 0)),
                    pl.BlockSpec((1, mid), lambda b, k: (0, 0)),
                    pl.BlockSpec((mid, C), lambda b, k: (0, 0)),
                    pl.BlockSpec((1, C), lambda b, k: (0, 0)),
                ],
                out_specs=pl.BlockSpec((1, 1, C), lambda b, k: (b, 0, 0)),
                scratch_shapes=[
                    pltpu.VMEM((1, C, _LANE), jnp.float32),  # lane-wide partial sums
                    pltpu.VMEM((1, C, _LANE), jnp.float32),  # lane-wide partial maxes
                ],
            ),
            compiler_params=pltpu.CompilerParams(
                dimension_semantics=("parallel", "arbitrary"),
                vmem_limit_bytes=vmem_limit,
            ),
            cost_estimate=cost,
        )(x_flat, w1_t, b1_r, w2_t, b2_r)

    return out.reshape(B, C, 1, 1)


def _reference(x, w1, b1, w2, b2):
    # Pure-JAX reference mirroring the PyTorch forward.
    avg = jnp.mean(x.astype(jnp.float32), axis=(2, 3))  # (B, C)
    mx = jnp.max(x.astype(jnp.float32), axis=(2, 3))    # (B, C)

    def mlp(v):
        h = jnp.maximum(v @ w1.T + b1, 0.0)
        return h @ w2.T + b2

    B, C = avg.shape
    return jax.nn.sigmoid(mlp(avg) + mlp(mx)).reshape(B, C, 1, 1)


def _make_params(key, C, mid):
    k1, k2, k3, k4 = jax.random.split(key, 4)
    bound1 = 1.0 / jnp.sqrt(C)
    w1 = jax.random.uniform(k1, (mid, C), minval=-bound1, maxval=bound1, dtype=jnp.float32)
    b1 = jax.random.uniform(k2, (mid,), minval=-bound1, maxval=bound1, dtype=jnp.float32)
    bound2 = 1.0 / jnp.sqrt(mid)
    w2 = jax.random.uniform(k3, (C, mid), minval=-bound2, maxval=bound2, dtype=jnp.float32)
    b2 = jax.random.uniform(k4, (C,), minval=-bound2, maxval=bound2, dtype=jnp.float32)
    return w1, b1, w2, b2


if __name__ == "__main__":
    key = jax.random.PRNGKey(0)
    key1, key2 = jax.random.split(key)

    # ---- Test 1: fused single-block path (module config c1=32, reduction=16). ----
    B, C, H, W = 2, 32, 16, 16
    reduction = 16
    mid = C // reduction
    kx, kp = jax.random.split(key1)
    x = jax.random.normal(kx, (B, C, H, W), dtype=jnp.float32)
    w1, b1, w2, b2 = _make_params(kp, C, mid)

    out = channel_attention(x, w1, b1, w2, b2)
    out = jax.block_until_ready(out)
    ref = _reference(x, w1, b1, w2, b2)
    assert out.shape == (B, C, 1, 1), out.shape
    assert jnp.allclose(out, ref, atol=1e-5, rtol=1e-5), float(jnp.max(jnp.abs(out - ref)))

    # ---- Test 2: streaming path with a ragged last HW tile (forced tiny budget). ----
    B2, C2, H2, W2 = 1, 32, 20, 20          # HW = 400 -> tiles of 128, ragged edge
    reduction2 = 4
    mid2 = C2 // reduction2
    kx2, kp2 = jax.random.split(key2)
    x2 = jax.random.normal(kx2, (B2, C2, H2, W2), dtype=jnp.float32)
    w1b, b1b, w2b, b2b = _make_params(kp2, C2, mid2)

    out2 = channel_attention(x2, w1b, b1b, w2b, b2b, block_budget_bytes=16 * 1024)
    out2 = jax.block_until_ready(out2)
    ref2 = _reference(x2, w1b, b1b, w2b, b2b)
    assert out2.shape == (B2, C2, 1, 1), out2.shape
    assert jnp.allclose(out2, ref2, atol=1e-5, rtol=1e-5), float(jnp.max(jnp.abs(out2 - ref2)))

    print("KERNEL_OK")
</pallas_src>

<mosaic_0001>
module attributes {stable_mosaic.version = 11 : i64} {
  func.func @kernel(%arg0: i32, %arg1: memref<2x32x256xf32, #tpu.memory_space<vmem>>, %arg2: memref<32x2xf32, #tpu.memory_space<vmem>>, %arg3: memref<1x2xf32, #tpu.memory_space<vmem>>, %arg4: memref<2x32xf32, #tpu.memory_space<vmem>>, %arg5: memref<1x32xf32, #tpu.memory_space<vmem>>, %arg6: memref<2x1x32xf32, #tpu.memory_space<vmem>>) attributes {dimension_semantics = [#tpu.dimension_semantics<parallel>], iteration_bounds = array<i64: 1>, scalar_prefetch = 0 : i64, scratch_operands = 0 : i64, tpu.core_type = #tpu.core_type<tc>, window_params = [{transform_indices = @transform_0, window_bounds = array<i64: 2, 32, 256>}, {pipeline_mode = #tpu.pipeline_mode<synchronous>, transform_indices = @transform_1, window_bounds = array<i64: 32, 2>}, {pipeline_mode = #tpu.pipeline_mode<synchronous>, transform_indices = @transform_2, window_bounds = array<i64: 1, 2>}, {pipeline_mode = #tpu.pipeline_mode<synchronous>, transform_indices = @transform_3, window_bounds = array<i64: 2, 32>}, {pipeline_mode = #tpu.pipeline_mode<synchronous>, transform_indices = @transform_4, window_bounds = array<i64: 1, 32>}, {transform_indices = @transform_5, window_bounds = array<i64: 2, 1, 32>}]} {
    %c0 = arith.constant 0 : index
    %c0_0 = arith.constant 0 : index
    %c0_1 = arith.constant 0 : index
    %0 = vector.load %arg1[%c0, %c0_0, %c0_1] : memref<2x32x256xf32, #tpu.memory_space<vmem>>, vector<2x32x256xf32>
    %cst = arith.constant dense<0.000000e+00> : vector<2x32xf32>
    %1 = vector.multi_reduction <add>, %0, %cst [2] : vector<2x32x256xf32> to vector<2x32xf32>
    %cst_2 = arith.constant 3.906250e-03 : f32
    %2 = vector.broadcast %cst_2 : f32 to vector<2x32xf32>
    %3 = arith.mulf %1, %2 : vector<2x32xf32>
    %cst_3 = arith.constant dense<0xFF800000> : vector<2x32xf32>
    %4 = vector.multi_reduction <maximumf>, %0, %cst_3 [2] : vector<2x32x256xf32> to vector<2x32xf32>
    %5 = tpu.concatenate %3, %4 in 0 : vector<2x32xf32>, vector<2x32xf32> -> vector<4x32xf32>
    %c0_4 = arith.constant 0 : index
    %c0_5 = arith.constant 0 : index
    %6 = vector.load %arg2[%c0_4, %c0_5] : memref<32x2xf32, #tpu.memory_space<vmem>>, vector<32x2xf32>
    %cst_6 = arith.constant dense<0.000000e+00> : vector<4x2xf32>
    %7 = tpu.matmul %5, %6, %cst_6 {dimension_numbers = #tpu.dot_dimension_numbers<[1], [0], [0], [1], [0, 0, 1, 1], [], []>} : vector<4x32xf32>, vector<32x2xf32>, vector<4x2xf32> -> vector<4x2xf32>
    %c0_7 = arith.constant 0 : index
    %c0_8 = arith.constant 0 : index
    %8 = vector.load %arg3[%c0_7, %c0_8] : memref<1x2xf32, #tpu.memory_space<vmem>>, vector<1x2xf32>
    %9 = vector.broadcast %8 : vector<1x2xf32> to vector<4x2xf32>
    %10 = arith.addf %7, %9 : vector<4x2xf32>
    %cst_9 = arith.constant 0.000000e+00 : f32
    %11 = vector.broadcast %cst_9 : f32 to vector<4x2xf32>
    %12 = arith.maximumf %10, %11 : vector<4x2xf32>
    %c0_10 = arith.constant 0 : index
    %c0_11 = arith.constant 0 : index
    %13 = vector.load %arg4[%c0_10, %c0_11] : memref<2x32xf32, #tpu.memory_space<vmem>>, vector<2x32xf32>
    %cst_12 = arith.constant dense<0.000000e+00> : vector<4x32xf32>
    %14 = tpu.matmul %12, %13, %cst_12 {dimension_numbers = #tpu.dot_dimension_numbers<[1], [0], [0], [1], [0, 0, 1, 1], [], []>} : vector<4x2xf32>, vector<2x32xf32>, vector<4x32xf32> -> vector<4x32xf32>
    %c0_13 = arith.constant 0 : index
    %c0_14 = arith.constant 0 : index
    %15 = vector.load %arg5[%c0_13, %c0_14] : memref<1x32xf32, #tpu.memory_space<vmem>>, vector<1x32xf32>
    %16 = vector.broadcast %15 : vector<1x32xf32> to vector<4x32xf32>
    %17 = arith.addf %14, %16 : vector<4x32xf32>
    %18 = vector.extract_strided_slice %17 {offsets = [0, 0], sizes = [2, 32], strides = [1, 1]} : vector<4x32xf32> to vector<2x32xf32>
    %19 = vector.extract_strided_slice %17 {offsets = [2, 0], sizes = [2, 32], strides = [1, 1]} : vector<4x32xf32> to vector<2x32xf32>
    %20 = arith.addf %18, %19 : vector<2x32xf32>
    %21 = arith.negf %20 : vector<2x32xf32>
    %22 = math.exp %21 : vector<2x32xf32>
    %cst_15 = arith.constant 1.000000e+00 : f32
    %23 = vector.broadcast %cst_15 : f32 to vector<2x32xf32>
    %24 = arith.addf %23, %22 : vector<2x32xf32>
    %25 = arith.divf %23, %24 : vector<2x32xf32>
    %26 = vector.shape_cast %25 : vector<2x32xf32> to vector<2x1x32xf32>
    %c0_16 = arith.constant 0 : index
    %c0_17 = arith.constant 0 : index
    %c0_18 = arith.constant 0 : index
    %27 = vector.load %arg6[%c0_16, %c0_17, %c0_18] : memref<2x1x32xf32, #tpu.memory_space<vmem>>, vector<2x1x32xf32>
    tpu.vector_store %arg6[%c0_16, %c0_17, %c0_18], %26 {strides = array<i32>} : memref<2x1x32xf32, #tpu.memory_space<vmem>>, vector<2x1x32xf32>,
    return
  }
  func.func @transform_0(%arg0: i32) -> (i32, i32, i32) {
    %c0_i32 = arith.constant 0 : i32
    %c0_i32_0 = arith.constant 0 : i32
    %c0_i32_1 = arith.constant 0 : i32
    return %arg0, %c0_i32, %c0_i32_0 : i32, i32, i32
  }
  func.func @transform_1(%arg0: i32) -> (i32, i32) {
    %c0_i32 = arith.constant 0 : i32
    %c0_i32_0 = arith.constant 0 : i32
    %c0_i32_1 = arith.constant 0 : i32
    return %c0_i32, %c0_i32_0 : i32, i32
  }
  func.func @transform_2(%arg0: i32) -> (i32, i32) {
    %c0_i32 = arith.constant 0 : i32
    %c0_i32_0 = arith.constant 0 : i32
    %c0_i32_1 = arith.constant 0 : i32
    return %c0_i32, %c0_i32_0 : i32, i32
  }
  func.func @transform_3(%arg0: i32) -> (i32, i32) {
    %c0_i32 = arith.constant 0 : i32
    %c0_i32_0 = arith.constant 0 : i32
    %c0_i32_1 = arith.constant 0 : i32
    return %c0_i32, %c0_i32_0 : i32, i32
  }
  func.func @transform_4(%arg0: i32) -> (i32, i32) {
    %c0_i32 = arith.constant 0 : i32
    %c0_i32_0 = arith.constant 0 : i32
    %c0_i32_1 = arith.constant 0 : i32
    return %c0_i32, %c0_i32_0 : i32, i32
  }
  func.func @transform_5(%arg0: i32) -> (i32, i32, i32) {
    %c0_i32 = arith.constant 0 : i32
    %c0_i32_0 = arith.constant 0 : i32
    %c0_i32_1 = arith.constant 0 : i32
    return %arg0, %c0_i32, %c0_i32_0 : i32, i32, i32
  }
}

</mosaic_0001>

<bundles_post_ra>
// kernel: tpu_custom_call.1
= control target key start
LH: loop header
LB: loop body
LE: loop exit
PB: predicated region body
PF: predicated region fallthrough
CT: control target
= control target key end

     0   :  { %10 = vsyncpa [#allocation3], 0  ;;  %s645_s0 = inlined_call_operand.hbm [shape: f32[2,32,256], index: 0, kind: input, shape index: {}]   ;;  %s646_s1 = inlined_call_operand.vmem [shape: f32[32,2], index: 1, kind: input, shape index: {}]   ;;  %s647_s2 = inlined_call_operand.vmem [shape: f32[1,2], index: 2, kind: input, shape index: {}]   ;;  %s648_s3 = inlined_call_operand.vmem [shape: f32[2,32], index: 3, kind: input, shape index: {}]   ;;  %s649_s4 = inlined_call_operand.vmem [shape: f32[1,32], index: 4, kind: input, shape index: {}]   ;;  %s650_s5 = inlined_call_operand.hbm [shape: f32[2,1,32], index: 5, kind: output, shape index: {}]  }
   0x1   :  { %11 = vsyncpa [#allocation4], 0  ;;  %s537_s18 = smov [#allocation2]   ;;  %s489_s22 = scalar_lea.hbm %s645_s0, 2048 }
   0x2   :  { %s17_s19 = sshll.u32 %s537_s18, 4  ;;  %p490_p0 = scmp.ne.s32.totalorder %s645_s0, %s489_s22  ;;  %s18_s19 = int_to_ptr.vmem [resolvable:$true] %s17_s19 }
   0x3   :  { %p493_p1 = scmp.lt.u32.totalorder %s489_s22, %s645_s0 }
   0x5   :  { %p495_p2 = pnand %p493_p1, %p490_p0 }
   0x7   :  { %498 = shalt.err (!%p495_p2)
}
   0x8   :  { %s499_s27 = scalar_lea.vmem %s18_s19, 2048  ;;  %p504_p4 = scmp.lt.s32.totalorder %s18_s19, %s18_s19 }
   0x9   :  { %p500_p3 = scmp.ne.s32.totalorder %s18_s19, %s499_s27  ;;  %p505_p5 = scmp.lt.s32.totalorder %s499_s27, %s499_s27 }
   0xb   :  { %p506_p6 = por %p505_p5, %p504_p4 }
   0xd   :  { %p507_p7 = pnand %p506_p6, %p500_p3 }
   0xf   :  { %510 = shalt.err (!%p507_p7)
}
  0x10   :  { %s538_s28 = smov 256   ;;  %s539_s29 = smov 16  }
  0x11   :  { %23 = dma.hbm_to_vmem [thread:$0]  %s645_s0, 2048, %s18_s19, [#allocation3], %s538_s28, %s538_s28, %s539_s29  }
  0x12   :  { %533 = dma.done.wait [#allocation3], 2048  }
  0x13   :  { %534 = vsyncadd [#allocation3], 4294965248  ;;  %v43_v0 = vld [vmem:[#allocation2 + $0x40] sm:$0xff]  ;;  %v44_v1 = vld [vmem:[#allocation2 + $0x48] sm:$0xff]  ;;  %v540_v35 = vmov 0.0|0.0   ;;  %vm541_vm0 = vmmov 0   ;;  %v115_v45 = vlaneseq }
  0x14   :  { %v35_v2 = vld [vmem:[#allocation2] sm:$0xff]  ;;  %v63_v3 = vadd.f32 %v44_v1, %v43_v0  ;;  %v36_v4 = vld [vmem:[#allocation2 + $0x8] sm:$0xff]  ;;  %v45_v5 = vld [vmem:[#allocation2 + $0x50] sm:$0xff]  ;;  %v95_v27 = vmax.f32 %v43_v0, %v44_v1  ;;  %470 = vmatprep.subr.bf16.mxu0 %v540_v35  ;;  %v542_v39 = vmov 0.0   ;;  %vm126_vm1 = vcmask 130112  }
  0x15   :  { %v46_v6 = vld [vmem:[#allocation2 + $0x58] sm:$0xff]  ;;  %v51_v7 = vadd.f32 %v36_v4, %v35_v2  ;;  %v37_v8 = vld [vmem:[#allocation2 + $0x10] sm:$0xff]  ;;  %v47_v12 = vld [vmem:[#allocation2 + $0x60] sm:$0xff]  ;;  %v83_v25 = vmax.f32 %v35_v2, %v36_v4  ;;  %462 = vmatprep.mubr.msk.f32.mxu0 %vm541_vm0, %v542_v39  ;;  %465 = vmatprep.subr.mxu1 %v542_v39  ;;  %v116_v48 = vand.u32 127, %v115_v45  ;;  %v601_v50 = vshrl.u32 %v115_v45, 7 }
  0x16   :  { %v38_v9 = vld [vmem:[#allocation2 + $0x18] sm:$0xff]  ;;  %64 = vadd.xlane.f32.xlu1 %v63_v3  ;;  %v66_v10 = vadd.f32 %v46_v6, %v45_v5  ;;  %v48_v13 = vld [vmem:[#allocation2 + $0x68] sm:$0xff]  ;;  %v39_v14 = vld [vmem:[#allocation2 + $0x20] sm:$0xff]  ;;  %v98_v26 = vmax.f32 %v45_v5, %v46_v6  ;;  %467 = vmatprep.mubr.msk.f32.mxu1 %vm541_vm0, %v542_v39  ;;  %vm133_vm2 = vcmask 195712   ;;  %vm140_vm3 = vcmask 261312  }
  0x17   :  { %52 = vadd.xlane.f32.xlu0 %v51_v7  ;;  %v54_v11 = vadd.f32 %v38_v9, %v37_v8  ;;  %v40_v15 = vld [vmem:[#allocation2 + $0x28] sm:$0xff]  ;;  %v69_v16 = vadd.f32 %v48_v13, %v47_v12  ;;  %v49_v18 = vld [vmem:[#allocation2 + $0x70] sm:$0xff]  ;;  %v50_v19 = vld [vmem:[#allocation2 + $0x78] sm:$0xff]  ;;  %v86_v24 = vmax.f32 %v37_v8, %v38_v9  ;;  %v101_v28 = vmax.f32 %v47_v12, %v48_v13 }
  0x18   :  { %v57_v17 = vadd.f32 %v40_v15, %v39_v14  ;;  %v41_v20 = vld [vmem:[#allocation2 + $0x30] sm:$0xff]  ;;  %v42_v21 = vld [vmem:[#allocation2 + $0x38] sm:$0xff]  ;;  %v72_v22 = vadd.f32 %v50_v19, %v49_v18  ;;  %v89_v29 = vmax.f32 %v39_v14, %v40_v15  ;;  %v104_v30 = vmax.f32 %v49_v18, %v50_v19  ;;  %v215_v32 = vld [vmem:[%s646_s1] sm:$0xff] }
  0x19   :  { %v60_v23 = vadd.f32 %v42_v21, %v41_v20  ;;  %v92_v31 = vmax.f32 %v41_v20, %v42_v21  ;;  %v216_v33 = vld [vmem:[%s646_s1 + $0x8] sm:$0xff]  ;;  %v217_v36 = vld [vmem:[%s646_s1 + $0x10] sm:$0xff]  ;;  %v218_v37 = vld [vmem:[%s646_s1 + $0x18] sm:$0xff]  ;;  %v121_v51 = vadd.s32 4294967288, %v116_v48  ;;  %v128_v52 = vadd.s32 4294967280, %v116_v48 }
  0x1a   :  { %67 = vadd.xlane.f32.xlu1 %v66_v10  ;;  %v471_v34 = vpack.c.bf16 %v216_v33, %v215_v32  ;;  %v474_v38 = vpack.c.bf16 %v218_v37, %v217_v36  ;;  %v135_v54 = vadd.s32 4294967272, %v116_v48  ;;  %v119_v56 = vsub.s32 %v116_v48, %v601_v50 }
  0x1b   :  { %55 = vadd.xlane.f32.xlu0 %v54_v11  ;;  %v124_v57 = vsub.s32 %v121_v51, %v601_v50  ;;  %v131_v59 = vsub.s32 %v128_v52, %v601_v50  ;;  %vm161_vm4 = vcmask 1041409   ;;  %vm210_vm5 = vcmask 1043459  }
  0x1c   :  { %472 = vmatpush3.bf16.msra.mxu0 %v471_v34  ;;  %v138_v2 = vsub.s32 %v135_v54, %v601_v50  ;;  %vm213_vm6 = vcmask 1041408   ;;  %vm226_vm7 = vcmask 261120   ;;  %vm309_vm8 = vcmask 15360  }
  0x1d   :  { %473 = vmatprep.subr.bf16.mxu0 %v540_v35  ;;  %vm421_vm9 = vcmask 253952  }
  0x1e   :  { %70 = vadd.xlane.f32.xlu1 %v69_v16 }
  0x1f   :  { %58 = vadd.xlane.f32.xlu0 %v57_v17 }
  0x20   :  { %475 = vmatpush3.bf16.msra.mxu0 %v474_v38 }
  0x22   :  { %73 = vadd.xlane.f32.xlu1 %v72_v22 }
  0x23   :  { %61 = vadd.xlane.f32.xlu0 %v60_v23 }
  0x26   :  { %87 = vmax.xlane.f32.xlu1 %v86_v24 }
  0x27   :  { %84 = vmax.xlane.f32.xlu0 %v83_v25 }
  0x2a   :  { %99 = vmax.xlane.f32.xlu1 %v98_v26 }
  0x2b   :  { %96 = vmax.xlane.f32.xlu0 %v95_v27 }
  0x2e   :  { %102 = vmax.xlane.f32.xlu1 %v101_v28 }
  0x2f   :  { %90 = vmax.xlane.f32.xlu0 %v89_v29 }
  0x32   :  { %105 = vmax.xlane.f32.xlu1 %v104_v30 }
  0x33   :  { %93 = vmax.xlane.f32.xlu0 %v92_v31 }
  0xa3   :  { %v65_v40 = vpop.xlane.xlu1 %64 }
  0xa4   :  { %v53_v41 = vpop.xlane.xlu0 %52  ;;  %v79_v60 = vmul.f32 0.00390625, %v65_v40 }
  0xa5   :  { %v75_v61 = vmul.f32 0.00390625, %v53_v41  ;;  %v301_v41 = vld [vmem:[%s648_s3] sm:$0x3] }
  0xa6   :  { %v145_v7 = vrot.slane %v79_v60, %v119_v56  ;;  %466 = vmatpush3.msk.msra.mxu1 %vm213_vm6, %v301_v41 }
  0xa7   :  { %v68_v42 = vpop.xlane.xlu1 %67  ;;  %v120_v8 = vrot.slane %v75_v61, %v119_v56 }
  0xa8   :  { %v56_v43 = vpop.xlane.xlu0 %55  ;;  %v80_v58 = vmul.f32 0.00390625, %v68_v42  ;;  %v441_v42 = vld [vmem:[%s647_s2] ss:$0 sm:$0xff]  ;;  %s544_s2 = smov [#allocation5]  }
  0xa9   :  { %v76_v62 = vmul.f32 0.00390625, %v56_v43  ;;  %s429_s3 = sshll.u32 %s544_s2, 4  ;;  %s430_s3 = int_to_ptr.vmem [resolvable:$true] %s429_s3 }
  0xaa   :  { %v149_v6 = vrot.slane %v80_v58, %v124_v57  ;;  %p516_p9 = scmp.lt.s32.totalorder %s430_s3, %s430_s3 }
  0xab   :  { %v71_v44 = vpop.xlane.xlu1 %70  ;;  %v125_v9 = vrot.slane %v76_v62, %v124_v57 }
  0xac   :  { %v59_v46 = vpop.xlane.xlu0 %58  ;;  %v81_v63 = vmul.f32 0.00390625, %v71_v44  ;;  %v150_v21 = vsel %vm126_vm1, %v149_v6, %v145_v7 }
  0xad   :  { %v77_v1 = vmul.f32 0.00390625, %v59_v46  ;;  %v127_v23 = vsel %vm126_vm1, %v125_v9, %v120_v8 }
  0xae   :  { %v154_v10 = vrot.slane %v81_v63, %v131_v59 }
  0xaf   :  { %v74_v47 = vpop.xlane.xlu1 %73  ;;  %v132_v12 = vrot.slane %v77_v1, %v131_v59 }
  0xb0   :  { %v62_v49 = vpop.xlane.xlu0 %61  ;;  %v82_v3 = vmul.f32 0.00390625, %v74_v47  ;;  %v155_v24 = vsel %vm133_vm2, %v154_v10, %v150_v21  ;;  %v443_v47 = vld [vmem:[%s649_s4] ss:$0 sm:$0xff]  ;;  %s511_s4 = scalar_lea.vmem %s430_s3, 32 }
  0xb1   :  { %v78_v5 = vmul.f32 0.00390625, %v62_v49  ;;  %v134_v26 = vsel %vm133_vm2, %v132_v12, %v127_v23  ;;  %p512_p8 = scmp.ne.s32.totalorder %s430_s3, %s511_s4  ;;  %p517_p10 = scmp.lt.s32.totalorder %s511_s4, %s511_s4 }
  0xb2   :  { %v159_v13 = vrot.slane %v82_v3, %v138_v2 }
  0xb3   :  { %v88_v53 = vpop.xlane.xlu1 %87  ;;  %v139_v17 = vrot.slane %v78_v5, %v138_v2  ;;  %p518_p11 = por %p517_p10, %p516_p9 }
  0xb4   :  { %v85_v55 = vpop.xlane.xlu0 %84  ;;  %v179_v18 = vrot.slane %v88_v53, %v124_v57  ;;  %v160_v27 = vsel %vm140_vm3, %v159_v13, %v155_v24 }
  0xb5   :  { %v175_v19 = vrot.slane %v85_v55, %v119_v56  ;;  %v141_v31 = vsel %vm140_vm3, %v139_v17, %v134_v26  ;;  %p519_p12 = pnand %p518_p11, %p512_p8 }
  0xb6   :  { %v162_v38 = vsel %vm161_vm4, %v160_v27, %v141_v31 }
  0xb7   :  { %v100_v0 = vpop.xlane.xlu1 %99  ;;  %v180_v32 = vsel %vm126_vm1, %v179_v18, %v175_v19 }
  0xb8   :  { %v97_v4 = vpop.xlane.xlu0 %96  ;;  %v198_v14 = vrot.slane %v100_v0, %v124_v57  ;;  %v543_v57 = vmov 1966171168  }
  0xb9   :  { %v194_v15 = vrot.slane %v97_v4, %v119_v56  ;;  %v398_v58 = vunpack.c.l.s4 %v543_v57 }
  0xbb   :  { %v103_v11 = vpop.xlane.xlu1 %102  ;;  %v199_v28 = vsel %vm126_vm1, %v198_v14, %v194_v15 }
  0xbc   :  { %v91_v16 = vpop.xlane.xlu0 %90  ;;  %v203_v20 = vrot.slane %v103_v11, %v131_v59 }
  0xbd   :  { %v184_v22 = vrot.slane %v91_v16, %v131_v59  ;;  %v399_v59 = vunpack.c.0.s8 %v398_v58 }
  0xbe   :  { %v204_v33 = vsel %vm133_vm2, %v203_v20, %v199_v28 }
  0xbf   :  { %v106_v25 = vpop.xlane.xlu1 %105  ;;  %v185_v35 = vsel %vm133_vm2, %v184_v22, %v180_v32  ;;  %v402_v60 = vsub.s32 %v399_v59, %v601_v50 }
  0xc0   :  { %v208_v29 = vrot.slane %v106_v25, %v138_v2  ;;  %v94_v30 = vpop.xlane.xlu0 %93 }
  0xc1   :  { %v189_v34 = vrot.slane %v94_v30, %v138_v2 }
  0xc2   :  { %v209_v36 = vsel %vm140_vm3, %v208_v29, %v204_v33 }
  0xc3   :  { %v190_v37 = vsel %vm140_vm3, %v189_v34, %v185_v35 }
  0xc4   :  { %v211_v39 = vsel %vm210_vm5, %v209_v36, %v190_v37 }
  0xc5   :  { %v214_v40 = vsel %vm213_vm6, %v162_v38, %v211_v39 }
  0xc6   :  { %463 = vmatmul.mubr.msk.f32.vlgmr.msra.gmra.mrb[0].mxu0 %vm226_vm7, %v214_v40 }
 0x199   :  { %v296_v43 = vpop.f32.mrb[0].mxu0 }
 0x19a   :  { %v297_v44 = vadd.f32 %v441_v42, %v296_v43  ;;  %v464_v45 = vpop.f32.mrb[1].mxu0 }
 0x19c   :  { %v300_v46 = vmax.f32 %v297_v44, 0.0 }
 0x19e   :  { %468 = vmatmul.mubr.msk.f32.vlgmr.msra.gmra.mrb[0].mxu1 %vm309_vm8, %v300_v46 }
 0x271   :  { %v382_v48 = vpop.f32.mrb[0].mxu1 }
 0x272   :  { %v383_v49 = vadd.f32 %v443_v47, %v382_v48  ;;  %v469_v51 = vpop.f32.mrb[1].mxu1 }
 0x274   :  { %v387_v52 = vrot.slane %v383_v49, 2 }
 0x276   :  { %v389_v53 = vadd.f32 %v387_v52, %v383_v49 }
 0x278   :  { %v446_v54 = vmul.f32 -1.442695, %v389_v53 }
 0x27a   :  { %485 = vpow2.f32 %v446_v54 }
 0x284   :  { %v486_v55 = vpop.eup %485 }
 0x285   :  { %v393_v56 = vadd.f32 1.0, %v486_v55 }
 0x287   :  { %487 = vrcp.f32 %v393_v56 }
 0x291   :  { %v488_v61 = vpop.eup %487 }
 0x292   :  { %v403_v62 = vrot.slane %v488_v61, %v402_v60 }
 0x294   :  { %v404_v63 = vcombine.high %v403_v62, %v403_v62  ;;  %v411_v0 = vrot.slane %v403_v62, %v402_v60 }
 0x296   :  { %v418_v1 = vrot.slane %v404_v63, %v402_v60  ;;  %422 = vst.msk [vmem:[#allocation5] sm:$0x1] %vm421_vm9, %v411_v0 }
 0x298   :  { %423 = vst.msk [vmem:[#allocation5 + $0x1] sm:$0x1] %vm421_vm9, %v418_v1 }
 0x299   :  { %522 = shalt.err (!%p519_p12)
}
 0x29a   :  { %s523_s21 = scalar_lea.hbm %s650_s5, 32 }
 0x29b   :  { %p524_p13 = scmp.ne.s32.totalorder %s650_s5, %s523_s21  ;;  %p527_p0 = scmp.lt.u32.totalorder %s523_s21, %s650_s5 }
 0x29d   :  { %p529_p1 = pnand %p527_p0, %p524_p13 }
 0x29f   :  { %532 = shalt.err (!%p529_p1)
}
 0x2a0   :  { %s545_s26 = smov 1  }
 0x2a1   :  { %435 = dma.vmem_to_hbm [thread:$0]  %s430_s3, 32, %s650_s5, [#allocation4], %s539_s29, %s539_s29, %s545_s26  }
 0x2a2   :  { %535 = dma.done.wait [#allocation4], 32  }
 0x2a3   :  { %536 = vsyncadd [#allocation4], 4294967264 }
 0x2a4   :  { %439 = vsyncpa [#allocation3], 1 }
 0x2a5   :  { %440 = vsyncpa [#allocation4], 1 }

</bundles_post_ra>
